<compile_context>
chip_gen: v6e
topology: v6e:2x2x1
jax: 0.10.0
libtpu: 0.0.40
codegen_flags: <defaults>
</compile_context>

<pallas_src>
import jax
import jax.numpy as jnp
from jax.experimental import pallas as pl
from jax.experimental.pallas import tpu as pltpu

KERNEL_SIZE = 4  # HealpixAvgUnpool.kernel_size

_MIB = 1024 * 1024
_MAX_ROW_TILE = 128                     # favor long lane-dense rows over tall tiles
_DEFAULT_PHYS_VMEM = 64 * _MIB          # conservative: v7x per-core VMEM
_DB_WORKING_SET_TARGET = 40 * _MIB      # double-buffered (in + out) block budget
_VMEM_HEADROOM = 8 * _MIB


def _round_up(v, m):
    return ((v + m - 1) // m) * m


def _round_down(v, m):
    return (v // m) * m


def _physical_vmem_bytes():
    """Best-effort physical VMEM query; conservative default if unavailable.

    This try/except only guards a host-side hardware query used for tile
    sizing (never the kernel itself), so it cannot mask kernel bugs.
    """
    try:
        info = pltpu.get_tpu_info()
        cap = getattr(info, "vmem_capacity_bytes", None)
        if cap:
            return int(cap)
    except Exception:  # noqa: BLE001 - config query only; safe default below
        pass
    return _DEFAULT_PHYS_VMEM


def _pick_tiles(R, P, dtype):
    """Pick (TR, TP, vmem_limit_bytes) for the (R, P) -> (R, 4P) unpool."""
    itemsize = int(jnp.dtype(dtype).itemsize)
    row_mult = max(8, 32 // itemsize)           # 8 f32, 16 bf16, 32 int8

    phys = _physical_vmem_bytes()
    vmem_cap = min((phys * 3) // 4, 96 * _MIB)  # 96 MiB on 128-MiB parts, 48 on v7x

    # Per-element VMEM cost of one (TR*TP) input element:
    #   double-buffered input + output blocks: 2 * (1 + K) * itemsize
    #   + K * itemsize safety margin for a possible relayout scratch copy.
    per_elem_db = 2 * (1 + KERNEL_SIZE) * itemsize
    per_elem_safe = per_elem_db + KERNEL_SIZE * itemsize
    elem_budget = min(
        _DB_WORKING_SET_TARGET // per_elem_db,
        max(vmem_cap - _VMEM_HEADROOM, 16 * _MIB) // per_elem_safe,
    )
    elem_budget = max(elem_budget, row_mult * 128)

    # Rows: full dim if small, else a cap that is a multiple of every row_mult.
    TR = R if R <= _MAX_ROW_TILE else _MAX_ROW_TILE

    # Pixels: as wide as the budget allows; multiple of 128 unless full dim.
    tp_budget = max(elem_budget // max(TR, 1), 128)
    TP = P if P <= tp_budget else _round_down(tp_budget, 128)

    # Megacore (v7x): make sure a non-trivial problem yields >= 2 grid blocks
    # along a "parallel" axis. Prefer splitting rows to keep output rows long.
    out_bytes = R * KERNEL_SIZE * P * itemsize
    if TR >= R and TP >= P and out_bytes >= _MIB:
        if R >= 2 * row_mult:
            TR = _round_up(pl.cdiv(R, 2), row_mult)
        elif P >= 256:
            TP = _round_down(max(pl.cdiv(P, 2), 128), 128)

    footprint = per_elem_db * TR * TP
    vmem_limit = int(min(max(footprint + 2 * _VMEM_HEADROOM, 32 * _MIB), vmem_cap))
    return TR, TP, vmem_limit


def _unpool_kernel(x_ref, o_ref):
    """x_ref: (TR, TP); o_ref: (TR, KERNEL_SIZE*TP) lane-dense interleave."""
    x = x_ref[...]
    tr, tp = x.shape
    # out[r, 4*p + k] = x[r, p]: broadcast along a new trailing axis, then
    # collapse the two minor dims (the relayout rides the XLU/VPU slots of
    # this otherwise DMA-bound kernel).
    y = jnp.broadcast_to(x[:, :, None], (tr, tp, KERNEL_SIZE))
    o_ref[...] = y.reshape(tr, tp * KERNEL_SIZE)


def healpix_avg_unpool(x, index=None):
    """Pallas equivalent of HealpixAvgUnpool.forward.

    Args:
      x: jnp array of shape [batch, feature, pixels].
      index: ignored (kept for API compatibility with the pooling classes).
    Returns:
      (unpooled, None) where unpooled has shape [batch, feature, 4*pixels].
    """
    del index
    B, C, P = x.shape
    K = KERNEL_SIZE
    R = B * C
    x2 = x.reshape(R, P)                          # leading-dims reshape: free
    TR, TP, vmem_limit = _pick_tiles(R, P, x2.dtype)
    grid = (pl.cdiv(R, TR), pl.cdiv(P, TP))
    itemsize = int(jnp.dtype(x2.dtype).itemsize)

    out2 = pl.pallas_call(
        _unpool_kernel,
        out_shape=jax.ShapeDtypeStruct((R, K * P), x2.dtype),
        grid=grid,
        in_specs=[pl.BlockSpec((TR, TP), lambda i, j: (i, j))],
        out_specs=pl.BlockSpec((TR, K * TP), lambda i, j: (i, j)),
        compiler_params=pltpu.CompilerParams(
            dimension_semantics=("parallel", "parallel"),
            vmem_limit_bytes=vmem_limit),
        cost_estimate=pl.CostEstimate(
            flops=0,
            transcendentals=0,
            bytes_accessed=(1 + K) * R * P * itemsize),
    )(x2)

    unpooled = out2.reshape(B, C, K * P)          # leading-dims reshape: free
    return unpooled, None


if __name__ == "__main__":
    key = jax.random.PRNGKey(0)
    k1, k2, k3 = jax.random.split(key, 3)

    # Small case matching the module's [batch x feature x pixels] layout.
    B, C, P = 2, 4, 16
    x_small = jax.random.normal(k1, (B, C, P), dtype=jnp.float32)
    out, indices = healpix_avg_unpool(x_small)
    out = jax.block_until_ready(out)
    ref = jnp.repeat(x_small, KERNEL_SIZE, axis=-1)
    assert out.shape == (B, C, P * KERNEL_SIZE), out.shape
    assert indices is None
    assert jnp.allclose(out, ref), "small case mismatch vs. nearest upsample"

    # Multi-block (row x pixel) grid with a realistic healpix pixel count
    # (nside=32 -> 12288 pixels); also exercises partial pixel blocks.
    B2, C2, P2 = 4, 64, 12288
    x_big = jax.random.normal(k2, (B2, C2, P2), dtype=jnp.float32)
    out2, _ = healpix_avg_unpool(x_big)
    out2 = jax.block_until_ready(out2)
    ref2 = jnp.repeat(x_big, KERNEL_SIZE, axis=-1)
    assert out2.shape == (B2, C2, P2 * KERNEL_SIZE), out2.shape
    assert jnp.allclose(out2, ref2), "tiled case mismatch vs. nearest upsample"

    # Odd, non-(8,128)-aligned shape (healpix nside=4 -> 192 pixels):
    # full-dim blocks, single-step grid.
    B3, C3, P3 = 2, 7, 192
    x_odd = jax.random.normal(k3, (B3, C3, P3), dtype=jnp.float32)
    out3, _ = healpix_avg_unpool(x_odd)
    out3 = jax.block_until_ready(out3)
    ref3 = jnp.repeat(x_odd, KERNEL_SIZE, axis=-1)
    assert out3.shape == (B3, C3, P3 * KERNEL_SIZE), out3.shape
    assert jnp.allclose(out3, ref3), "odd-shape case mismatch vs. nearest upsample"

    print("KERNEL_OK")
</pallas_src>

<mosaic_0001>
module attributes {stable_mosaic.version = 11 : i64} {
  func.func @_unpool_kernel(%arg0: i32, %arg1: i32, %arg2: memref<8x16xf32, #tpu.memory_space<vmem>>, %arg3: memref<8x64xf32, #tpu.memory_space<vmem>>) attributes {dimension_semantics = [#tpu.dimension_semantics<parallel>, #tpu.dimension_semantics<parallel>], iteration_bounds = array<i64: 1, 1>, scalar_prefetch = 0 : i64, scratch_operands = 0 : i64, tpu.core_type = #tpu.core_type<tc>, window_params = [{transform_indices = @transform_0, window_bounds = array<i64: 8, 16>}, {transform_indices = @transform_1, window_bounds = array<i64: 8, 64>}]} {
    %c0 = arith.constant 0 : index
    %c0_0 = arith.constant 0 : index
    %0 = vector.load %arg2[%c0, %c0_0] : memref<8x16xf32, #tpu.memory_space<vmem>>, vector<8x16xf32>
    %1 = vector.shape_cast %0 : vector<8x16xf32> to vector<8x16x1xf32>
    %2 = vector.shape_cast %1 : vector<8x16x1xf32> to vector<8x16x1xf32>
    %3 = vector.broadcast %2 : vector<8x16x1xf32> to vector<8x16x4xf32>
    %4 = vector.shape_cast %3 : vector<8x16x4xf32> to vector<8x64xf32>
    %c0_1 = arith.constant 0 : index
    %c0_2 = arith.constant 0 : index
    %5 = vector.load %arg3[%c0_1, %c0_2] : memref<8x64xf32, #tpu.memory_space<vmem>>, vector<8x64xf32>
    tpu.vector_store %arg3[%c0_1, %c0_2], %4 {strides = array<i32>} : memref<8x64xf32, #tpu.memory_space<vmem>>, vector<8x64xf32>,
    return
  }
  func.func @transform_0(%arg0: i32, %arg1: i32) -> (i32, i32) {
    %c0_i32 = arith.constant 0 : i32
    return %arg0, %arg1 : i32, i32
  }
  func.func @transform_1(%arg0: i32, %arg1: i32) -> (i32, i32) {
    %c0_i32 = arith.constant 0 : i32
    return %arg0, %arg1 : i32, i32
  }
}

</mosaic_0001>

<bundles_post_ra>
// kernel: tpu_custom_call.1
= control target key start
LH: loop header
LB: loop body
LE: loop exit
PB: predicated region body
PF: predicated region fallthrough
CT: control target
= control target key end

     0   :  { %6 = vsyncpa [#allocation3], 0  ;;  %s646_s0 = inlined_call_operand.hbm [shape: f32[8,16], index: 0, kind: input, shape index: {}]   ;;  %s647_s1 = inlined_call_operand.hbm [shape: f32[8,64], index: 1, kind: output, shape index: {}]  }
   0x1   :  { %7 = vsyncpa [#allocation4], 0  ;;  %s552_s6 = smov [#allocation2]  }
   0x2   :  { %s14_s7 = sshll.u32 %s552_s6, 4  ;;  %s15_s7 = int_to_ptr.vmem [resolvable:$true] %s14_s7 }
   0x3   :  { %s516_s8 = scalar_lea.vmem %s15_s7, 128  ;;  %p521_p1 = scmp.lt.s32.totalorder %s15_s7, %s15_s7 }
   0x4   :  { %p517_p0 = scmp.ne.s32.totalorder %s15_s7, %s516_s8  ;;  %p522_p2 = scmp.lt.s32.totalorder %s516_s8, %s516_s8 }
   0x6   :  { %p523_p3 = por %p522_p2, %p521_p1 }
   0x8   :  { %p524_p4 = pnand %p523_p3, %p517_p0 }
   0xa   :  { %527 = shalt.err (!%p524_p4)
}
   0xb   :  { %17 = dma.hbm_to_vmem [thread:$0]  %s646_s0, 128, %s15_s7, [#allocation3]  }
   0xc   :  { %548 = dma.done.wait [#allocation3], 128  }
   0xd   :  { %549 = vsyncadd [#allocation3], 4294967168  ;;  %v22_v0 = vlaneseq  ;;  %v21_v6 = vld [vmem:[#allocation2] sm:$0xff]  ;;  %v553_v21 = vmov 1983009808   ;;  %s555_s0 = smov 8  }
   0xe   :  { %v113_v22 = vunpack.c.l.s4 %v553_v21  ;;  %v554_v26 = vmov 1934713408   ;;  %s556_s11 = smov 4   ;;  %s557_s12 = smov 16   ;;  %vm442_vm0 = vcmask 31744   ;;  %vm444_vm1 = vcmask 64512  }
   0xf   :  { %v584_v1 = vshrl.u32 %v22_v0, 7  ;;  %v177_v27 = vunpack.c.l.s4 %v554_v26  ;;  %s558_s13 = smov 12   ;;  %s559_s14 = smov 24   ;;  %vm446_vm2 = vcmask 97280   ;;  %vm448_vm3 = vcmask 130048  }
  0x10   :  { %v114_v25 = vunpack.c.0.s8 %v113_v22  ;;  %s560_s15 = smov 20   ;;  %s561_s16 = smov 28   ;;  %vm450_vm4 = vcmask 162816   ;;  %vm452_vm5 = vcmask 195584   ;;  %vm454_vm6 = vcmask 228352  }
  0x11   :  { %v46_v2 = vsub.s32 2, %v584_v1  ;;  %v24_v3 = vsub.s32 0, %v584_v1  ;;  %v57_v4 = vsub.s32 3, %v584_v1  ;;  %v35_v5 = vsub.s32 1, %v584_v1  ;;  %s562_s17 = smov 32   ;;  %s563_s18 = smov 36  }
  0x12   :  { %v79_v11 = vsub.s32 5, %v584_v1  ;;  %v68_v12 = vsub.s32 4, %v584_v1  ;;  %v101_v15 = vsub.s32 7, %v584_v1  ;;  %v90_v16 = vsub.s32 6, %v584_v1  ;;  %s564_s19 = smov 40   ;;  %s565_s20 = smov 44  }
  0x13   :  { %v47_v7 = vrot.slane %v21_v6, %v46_v2  ;;  %v25_v8 = vrot.slane %v21_v6, %v24_v3  ;;  %v58_v9 = vrot.slane %v21_v6, %v57_v4  ;;  %v36_v10 = vrot.slane %v21_v6, %v35_v5  ;;  %s566_s21 = smov 48   ;;  %s567_s22 = smov 52  }
  0x14   :  { %v80_v13 = vrot.slane %v21_v6, %v79_v11  ;;  %v69_v14 = vrot.slane %v21_v6, %v68_v12  ;;  %v102_v17 = vrot.slane %v21_v6, %v101_v15  ;;  %v91_v18 = vrot.slane %v21_v6, %v90_v16  ;;  %s568_s23 = smov 56   ;;  %s569_s24 = smov 60  }
  0x15   :  { %49 = vbcast.lane.b32.xlu1 %v47_v7, 256  ;;  %27 = vbcast.lane.b32.xlu0 %v25_v8, 256  ;;  %v595_v31 = vsub.s32 %v114_v25, %v584_v1  ;;  %v178_v33 = vunpack.c.0.s8 %v177_v27  ;;  %vm456_vm7 = vcmask 261120   ;;  %vm458_vm8 = vcmask 293888   ;;  %s570_s25 = smov [#allocation5]  }
  0x16   :  { %vm460_vm9 = vcmask 326656   ;;  %vm462_vm10 = vcmask 359424   ;;  %vm464_vm11 = vcmask 392192   ;;  %vm466_vm12 = vcmask 424960   ;;  %s480_s26 = sshll.u32 %s570_s25, 4  ;;  %s481_s26 = int_to_ptr.vmem [resolvable:$true] %s480_s26 }
  0x17   :  { %v604_v48 = vsub.s32 %v178_v33, %v584_v1  ;;  %vm468_vm13 = vcmask 457728   ;;  %vm470_vm14 = vcmask 490496   ;;  %vm472_vm15 = vcmask 523264   ;;  %s528_s27 = scalar_lea.vmem %s481_s26, 128  ;;  %p533_p6 = scmp.lt.s32.totalorder %s481_s26, %s481_s26 }
  0x18   :  { %p529_p5 = scmp.ne.s32.totalorder %s481_s26, %s528_s27  ;;  %p534_p7 = scmp.lt.s32.totalorder %s528_s27, %s528_s27 }
  0x19   :  { %60 = vbcast.lane.b32.xlu1 %v58_v9, 256  ;;  %38 = vbcast.lane.b32.xlu0 %v36_v10, 256 }
  0x1a   :  { %p535_p8 = por %p534_p7, %p533_p6 }
  0x1c   :  { %p536_p9 = pnand %p535_p8, %p529_p5 }
  0x1d   :  { %82 = vbcast.lane.b32.xlu1 %v80_v13, 256  ;;  %71 = vbcast.lane.b32.xlu0 %v69_v14, 256 }
  0x21   :  { %104 = vbcast.lane.b32.xlu1 %v102_v17, 256  ;;  %93 = vbcast.lane.b32.xlu0 %v91_v18, 256 }
  0x25   :  { %42 = vbcast.lane.b32.xlu1 %v36_v10, 264  ;;  %31 = vbcast.lane.b32.xlu0 %v25_v8, 264 }
  0x29   :  { %64 = vbcast.lane.b32.xlu1 %v58_v9, 264  ;;  %53 = vbcast.lane.b32.xlu0 %v47_v7, 264 }
  0x2d   :  { %86 = vbcast.lane.b32.xlu1 %v80_v13, 264  ;;  %75 = vbcast.lane.b32.xlu0 %v69_v14, 264 }
  0x31   :  { %108 = vbcast.lane.b32.xlu1 %v102_v17, 264  ;;  %97 = vbcast.lane.b32.xlu0 %v91_v18, 264 }
  0x87   :  { %v50_v19 = vpop.permute.xlu1 %49  ;;  %v28_v20 = vpop.permute.xlu0 %27 }
  0x88   :  { %v110_v32 = vcombine.low %v28_v20, %v50_v19  ;;  %v111_v42 = vcombine.high %v28_v20, %v50_v19 }
  0x8a   :  { %v118_v43 = vrot.slane %v110_v32, %v595_v31  ;;  %v125_v56 = vrot.slane %v111_v42, %v595_v31 }
  0x8b   :  { %v61_v23 = vpop.permute.xlu1 %60  ;;  %v39_v24 = vpop.permute.xlu0 %38 }
  0x8c   :  { %v126_v28 = vcombine.low %v39_v24, %v61_v23  ;;  %v127_v34 = vcombine.high %v39_v24, %v61_v23 }
  0x8e   :  { %v134_v35 = vrot.slane %v126_v28, %v595_v31  ;;  %v141_v49 = vrot.slane %v127_v34, %v595_v31 }
  0x8f   :  { %v83_v29 = vpop.permute.xlu1 %82  ;;  %v72_v30 = vpop.permute.xlu0 %71 }
  0x90   :  { %v174_v50 = vcombine.low %v118_v43, %v134_v35  ;;  %v175_v51 = vcombine.high %v118_v43, %v134_v35  ;;  %v190_v60 = vcombine.low %v125_v56, %v141_v49  ;;  %v191_v7 = vcombine.high %v125_v56, %v141_v49 }
  0x92   :  { %v189_v63 = vrot.slane %v175_v51, %v604_v48  ;;  %v614_v0 = vrot.slane %v174_v50, %v604_v48  ;;  %v198_v10 = vrot.slane %v190_v60, %v604_v48  ;;  %v205_v19 = vrot.slane %v191_v7, %v604_v48 }
  0x93   :  { %v105_v36 = vpop.permute.xlu1 %104  ;;  %v94_v37 = vpop.permute.xlu0 %93 }
  0x94   :  { %v158_v38 = vcombine.low %v83_v29, %v105_v36  ;;  %v159_v39 = vcombine.high %v83_v29, %v105_v36  ;;  %v142_v40 = vcombine.low %v72_v30, %v94_v37  ;;  %v143_v41 = vcombine.high %v72_v30, %v94_v37 }
  0x96   :  { %v166_v44 = vrot.slane %v158_v38, %v595_v31  ;;  %v173_v45 = vrot.slane %v159_v39, %v595_v31  ;;  %v150_v46 = vrot.slane %v142_v40, %v595_v31  ;;  %v157_v47 = vrot.slane %v143_v41, %v595_v31 }
  0x97   :  { %v43_v52 = vpop.permute.xlu1 %42  ;;  %v32_v53 = vpop.permute.xlu0 %31 }
  0x98   :  { %v206_v54 = vcombine.low %v150_v46, %v166_v44  ;;  %v207_v55 = vcombine.high %v150_v46, %v166_v44  ;;  %v222_v57 = vcombine.low %v157_v47, %v173_v45  ;;  %v223_v1 = vcombine.high %v157_v47, %v173_v45 }
  0x9a   :  { %v221_v58 = vrot.slane %v207_v55, %v604_v48  ;;  %v610_v59 = vrot.slane %v206_v54, %v604_v48  ;;  %v230_v4 = vrot.slane %v222_v57, %v604_v48  ;;  %v237_v13 = vrot.slane %v223_v1, %v604_v48 }
  0x9b   :  { %v65_v61 = vpop.permute.xlu1 %64  ;;  %v54_v62 = vpop.permute.xlu0 %53 }
  0x9c   :  { %v240_v2 = vcombine.low %v189_v63, %v221_v58  ;;  %v239_v3 = vcombine.high %v614_v0, %v610_v59  ;;  %v262_v5 = vcombine.low %v43_v52, %v65_v61  ;;  %v246_v6 = vcombine.low %v32_v53, %v54_v62 }
  0x9d   :  { %v242_v11 = vcombine.low %v198_v10, %v230_v4  ;;  %v241_v12 = vcombine.high %v189_v63, %v221_v58  ;;  %v238_v14 = vcombine.low %v614_v0, %v610_v59  ;;  %v263_v24 = vcombine.high %v43_v52, %v65_v61 }
  0x9e   :  { %387 = vrot.lane.b32.xlu1 %v240_v2, %s555_s0  ;;  %383 = vrot.lane.b32.xlu0 %v239_v3, %s556_s11  ;;  %v270_v15 = vrot.slane %v262_v5, %v595_v31  ;;  %v254_v16 = vrot.slane %v246_v6, %v595_v31  ;;  %v244_v25 = vcombine.low %v205_v19, %v237_v13 }
  0x9f   :  { %v87_v8 = vpop.permute.xlu1 %86  ;;  %v76_v9 = vpop.permute.xlu0 %75  ;;  %v243_v26 = vcombine.high %v198_v10, %v230_v4  ;;  %v247_v27 = vcombine.high %v32_v53, %v54_v62  ;;  %v277_v36 = vrot.slane %v263_v24, %v595_v31  ;;  %v245_v37 = vcombine.high %v205_v19, %v237_v13 }
  0xa0   :  { %v310_v28 = vcombine.low %v254_v16, %v270_v15  ;;  %v311_v39 = vcombine.high %v254_v16, %v270_v15 }
  0xa1   :  { %v261_v38 = vrot.slane %v247_v27, %v595_v31 }
  0xa2   :  { %395 = vrot.lane.b32.xlu1 %v242_v11, %s557_s12  ;;  %391 = vrot.lane.b32.xlu0 %v241_v12, %s558_s13  ;;  %v318_v40 = vrot.slane %v310_v28, %v604_v48  ;;  %v325_v47 = vrot.slane %v311_v39, %v604_v48 }
  0xa3   :  { %v109_v17 = vpop.permute.xlu1 %108  ;;  %v98_v18 = vpop.permute.xlu0 %97  ;;  %v326_v46 = vcombine.low %v261_v38, %v277_v36  ;;  %v327_v52 = vcombine.high %v261_v38, %v277_v36 }
  0xa4   :  { %v294_v20 = vcombine.low %v87_v8, %v109_v17  ;;  %v295_v21 = vcombine.high %v87_v8, %v109_v17  ;;  %v278_v22 = vcombine.low %v76_v9, %v98_v18  ;;  %v279_v23 = vcombine.high %v76_v9, %v98_v18 }
  0xa5   :  { %v334_v53 = vrot.slane %v326_v46, %v604_v48  ;;  %v341_v57 = vrot.slane %v327_v52, %v604_v48 }
  0xa6   :  { %v302_v29 = vrot.slane %v294_v20, %v595_v31  ;;  %v286_v30 = vrot.slane %v278_v22, %v595_v31  ;;  %403 = vrot.lane.b32.xlu1 %v244_v25, %s559_s14  ;;  %399 = vrot.lane.b32.xlu0 %v243_v26, %s560_s15  ;;  %v309_v32 = vrot.slane %v295_v21, %v595_v31 }
  0xa7   :  { %v293_v33 = vrot.slane %v279_v23, %v595_v31 }
  0xa8   :  { %v342_v34 = vcombine.low %v286_v30, %v302_v29  ;;  %v343_v35 = vcombine.high %v286_v30, %v302_v29 }
  0xa9   :  { %v358_v42 = vcombine.low %v293_v33, %v309_v32  ;;  %v359_v31 = vcombine.high %v293_v33, %v309_v32 }
  0xaa   :  { %v350_v41 = vrot.slane %v342_v34, %v604_v48  ;;  %407 = vrot.lane.b32.xlu0 %v245_v37, %s561_s16  ;;  %v357_v45 = vrot.slane %v343_v35, %v604_v48 }
  0xab   :  { %v366_v50 = vrot.slane %v358_v42, %v604_v48  ;;  %v373_v55 = vrot.slane %v359_v31, %v604_v48 }
  0xac   :  { %v375_v43 = vcombine.high %v318_v40, %v350_v41  ;;  %v374_v44 = vcombine.low %v318_v40, %v350_v41  ;;  %v376_v49 = vcombine.low %v325_v47, %v357_v45  ;;  %v377_v51 = vcombine.high %v325_v47, %v357_v45 }
  0xad   :  { %v378_v54 = vcombine.low %v334_v53, %v366_v50  ;;  %v379_v56 = vcombine.high %v334_v53, %v366_v50  ;;  %v380_v58 = vcombine.low %v341_v57, %v373_v55  ;;  %v381_v60 = vcombine.high %v341_v57, %v373_v55 }
  0xae   :  { %411 = vrot.lane.b32.xlu1 %v374_v44, %s562_s17  ;;  %415 = vrot.lane.b32.xlu0 %v375_v43, %s563_s18 }
  0xb2   :  { %419 = vrot.lane.b32.xlu1 %v376_v49, %s564_s19  ;;  %423 = vrot.lane.b32.xlu0 %v377_v51, %s565_s20 }
  0xb6   :  { %427 = vrot.lane.b32.xlu1 %v378_v54, %s566_s21  ;;  %431 = vrot.lane.b32.xlu0 %v379_v56, %s567_s22 }
  0xba   :  { %435 = vrot.lane.b32.xlu1 %v380_v58, %s568_s23  ;;  %439 = vrot.lane.b32.xlu0 %v381_v60, %s569_s24 }
 0x110   :  { %v388_v61 = vpop.permute.xlu1 %387  ;;  %v384_v62 = vpop.permute.xlu0 %383 }
 0x111   :  { %v443_v63 = vsel %vm442_vm0, %v238_v14, %v384_v62 }
 0x112   :  { %v445_v48 = vsel %vm444_vm1, %v443_v63, %v388_v61 }
 0x114   :  { %v392_v1 = vpop.permute.xlu0 %391  ;;  %v396_v2 = vpop.permute.xlu1 %395 }
 0x115   :  { %v447_v3 = vsel %vm446_vm2, %v445_v48, %v392_v1 }
 0x116   :  { %v449_v5 = vsel %vm448_vm3, %v447_v3, %v396_v2 }
 0x118   :  { %v400_v4 = vpop.permute.xlu0 %399  ;;  %v404_v6 = vpop.permute.xlu1 %403 }
 0x119   :  { %v451_v7 = vsel %vm450_vm4, %v449_v5, %v400_v4 }
 0x11a   :  { %v453_v9 = vsel %vm452_vm5, %v451_v7, %v404_v6 }
 0x11c   :  { %v408_v8 = vpop.permute.xlu0 %407 }
 0x11d   :  { %v455_v10 = vsel %vm454_vm6, %v453_v9, %v408_v8 }
 0x120   :  { %v412_v59 = vpop.permute.xlu1 %411  ;;  %v416_v11 = vpop.permute.xlu0 %415 }
 0x121   :  { %v457_v0 = vsel %vm456_vm7, %v455_v10, %v412_v59 }
 0x122   :  { %v459_v12 = vsel %vm458_vm8, %v457_v0, %v416_v11 }
 0x124   :  { %v420_v13 = vpop.permute.xlu1 %419  ;;  %v424_v15 = vpop.permute.xlu0 %423 }
 0x125   :  { %v461_v14 = vsel %vm460_vm9, %v459_v12, %v420_v13 }
 0x126   :  { %v463_v16 = vsel %vm462_vm10, %v461_v14, %v424_v15 }
 0x128   :  { %v428_v17 = vpop.permute.xlu1 %427  ;;  %v432_v19 = vpop.permute.xlu0 %431 }
 0x129   :  { %v465_v18 = vsel %vm464_vm11, %v463_v16, %v428_v17 }
 0x12a   :  { %v467_v20 = vsel %vm466_vm12, %v465_v18, %v432_v19 }
 0x12c   :  { %v436_v21 = vpop.permute.xlu1 %435  ;;  %v440_v23 = vpop.permute.xlu0 %439 }
 0x12d   :  { %v469_v22 = vsel %vm468_vm13, %v467_v20, %v436_v21 }
 0x12e   :  { %v471_v24 = vsel %vm470_vm14, %v469_v22, %v440_v23 }
 0x12f   :  { %473 = vst.msk [vmem:[#allocation5] sm:$0xff] %vm472_vm15, %v471_v24 }
 0x130   :  { %539 = shalt.err (!%p536_p9)
}
 0x131   :  { %483 = dma.vmem_to_hbm [thread:$0]  %s481_s26, 128, %s647_s1, [#allocation4]  }
 0x132   :  { %550 = dma.done.wait [#allocation4], 128  }
 0x133   :  { %551 = vsyncadd [#allocation4], 4294967168 }
 0x134   :  { %487 = vsyncpa [#allocation3], 1 }
 0x135   :  { %488 = vsyncpa [#allocation4], 1 }

</bundles_post_ra>
